<compile_context>
chip_gen: v7x
topology: tpu7x:2x2x1
jax: 0.10.0
libtpu: 0.0.40
codegen_flags: <defaults>
</compile_context>

<pallas_src>
import functools

import jax
import jax.numpy as jnp
from jax.experimental import pallas as pl
from jax.experimental.pallas import tpu as pltpu


def _ppo_policy_kernel(x_ref, w1_ref, b1_ref, w2_ref, b2_ref, out_ref):
    """Fused MLP + softmax for one batch tile.

    x_ref:   (TB, state_dim)   f32  (cast to bf16 in-kernel for the MXU)
    w1_ref:  (state_dim, 64)   bf16 (resident)
    b1_ref:  (1, 64)           f32
    w2_ref:  (64, action_dim)  bf16 (resident)
    b2_ref:  (1, action_dim)   f32
    out_ref: (TB, action_dim)  f32  -- softmax probabilities
    """
    # Cast activations to bf16 on the VPU (free under the HBM roofline); MXU
    # matmuls accumulate in f32 via preferred_element_type.
    x_bf = x_ref[...].astype(jnp.bfloat16)
    h = jnp.dot(x_bf, w1_ref[...],
                preferred_element_type=jnp.float32) + b1_ref[...]
    h = jnp.maximum(h, 0.0)

    logits = jnp.dot(h.astype(jnp.bfloat16), w2_ref[...],
                     preferred_element_type=jnp.float32) + b2_ref[...]

    # Numerically stable softmax over the last dim, fully in f32.
    # Exact divide (not approx reciprocal) so each row sums to 1 exactly
    # (to f32 rounding) -- needed for downstream log-prob math.
    m = jnp.max(logits, axis=-1, keepdims=True)
    e = jnp.exp(logits - m)
    denom = jnp.sum(e, axis=-1, keepdims=True)
    out_ref[...] = e / denom


def _round_up(x, m):
    return pl.cdiv(x, m) * m


@functools.partial(jax.jit, static_argnames=("tile_b",))
def ppo_policy_forward(x, w1, b1, w2, b2, *, tile_b=4096):
    """Runs the fused PPOPolicy forward pass via pallas_call.

    x: (B, state_dim) float32 (or (state_dim,) for a single state).
    Returns (B, action_dim) float32 action probabilities (or (action_dim,)).
    """
    squeeze = x.ndim == 1
    if squeeze:
        x = x[None, :]

    B, state_dim = x.shape
    hidden = w1.shape[1]
    action_dim = w2.shape[1]

    b1 = b1.reshape(1, hidden)
    b2 = b2.reshape(1, action_dim)

    # Tile selection:
    #  * large default tile to amortize the ~0.35us fixed per-grid-step cost,
    #  * multiple of 16 rows (sublane alignment),
    #  * capped so the grid has >=2 steps when B allows it, letting the
    #    "parallel" batch axis shard across both TensorCores on v7x.
    tb = min(int(tile_b), max(16, _round_up(pl.cdiv(B, 2), 16)))
    tb = max(16, _round_up(tb, 16))
    grid = (pl.cdiv(B, tb),)

    out = pl.pallas_call(
        _ppo_policy_kernel,
        out_shape=jax.ShapeDtypeStruct((B, action_dim), jnp.float32),
        grid=grid,
        in_specs=[
            # batch-tiled activations (f32, single HBM pass; cast in-kernel)
            pl.BlockSpec((tb, state_dim), lambda i: (i, 0)),
            # weights / biases: constant block index -> stay resident in VMEM
            pl.BlockSpec((state_dim, hidden), lambda i: (0, 0)),
            pl.BlockSpec((1, hidden), lambda i: (0, 0)),
            pl.BlockSpec((hidden, action_dim), lambda i: (0, 0)),
            pl.BlockSpec((1, action_dim), lambda i: (0, 0)),
        ],
        out_specs=pl.BlockSpec((tb, action_dim), lambda i: (i, 0)),
        compiler_params=pltpu.CompilerParams(
            dimension_semantics=("parallel",)
        ),
    )(
        x.astype(jnp.float32),
        w1.astype(jnp.bfloat16),
        b1.astype(jnp.float32),
        w2.astype(jnp.bfloat16),
        b2.astype(jnp.float32),
    )

    if squeeze:
        out = out[0]
    return out


def init_params(key, state_dim, hidden, action_dim):
    """Deterministic PyTorch-style (uniform +-1/sqrt(fan_in)) initialization."""
    k1, k2, k3, k4 = jax.random.split(key, 4)
    bound1 = 1.0 / jnp.sqrt(state_dim)
    bound2 = 1.0 / jnp.sqrt(hidden)
    w1 = jax.random.uniform(k1, (state_dim, hidden), jnp.float32, -bound1, bound1)
    b1 = jax.random.uniform(k2, (1, hidden), jnp.float32, -bound1, bound1)
    w2 = jax.random.uniform(k3, (hidden, action_dim), jnp.float32, -bound2, bound2)
    b2 = jax.random.uniform(k4, (1, action_dim), jnp.float32, -bound2, bound2)
    return w1, b1, w2, b2


def _reference_bf16(x, w1, b1, w2, b2):
    """Mirrors the kernel's bf16-input / f32-accumulate math in plain JAX."""
    h = jnp.dot(x.astype(jnp.bfloat16), w1.astype(jnp.bfloat16),
                preferred_element_type=jnp.float32) + b1.reshape(1, -1)
    h = jnp.maximum(h, 0.0)
    logits = jnp.dot(h.astype(jnp.bfloat16), w2.astype(jnp.bfloat16),
                     preferred_element_type=jnp.float32) + b2.reshape(1, -1)
    return jax.nn.softmax(logits, axis=-1)


def _reference_f32(x, w1, b1, w2, b2):
    h = jnp.maximum(x @ w1 + b1.reshape(1, -1), 0.0)
    return jax.nn.softmax(h @ w2 + b2.reshape(1, -1), axis=-1)


if __name__ == "__main__":
    # Small shapes consistent with the module: x is (batch, state_dim).
    # B=50 is deliberately not a multiple of the tile to exercise the ragged
    # last block (no wrapper pad).
    B, STATE_DIM, HIDDEN, ACTION_DIM = 50, 32, 64, 8

    key = jax.random.PRNGKey(0)
    kx, kp = jax.random.split(key)
    x = jax.random.normal(kx, (B, STATE_DIM), dtype=jnp.float32)
    w1, b1, w2, b2 = init_params(kp, STATE_DIM, HIDDEN, ACTION_DIM)

    # Default path: tile capped to give 2 parallel grid steps (v7x megacore),
    # last block ragged.
    probs = jax.block_until_ready(ppo_policy_forward(x, w1, b1, w2, b2))
    # Small explicit tile: 4 grid steps, ragged last block.
    probs_small = jax.block_until_ready(
        ppo_policy_forward(x, w1, b1, w2, b2, tile_b=16))
    # act()-style single state (1-D input -> 1-D output).
    single = jax.block_until_ready(ppo_policy_forward(x[0], w1, b1, w2, b2))

    ref_bf16 = _reference_bf16(x, w1, b1, w2, b2)
    ref_f32 = _reference_f32(x, w1, b1, w2, b2)

    assert probs.shape == (B, ACTION_DIM)
    assert probs_small.shape == (B, ACTION_DIM)
    assert single.shape == (ACTION_DIM,)
    # Tiling must not change the math.
    assert jnp.allclose(probs_small, probs, atol=1e-5, rtol=1e-5)
    assert jnp.allclose(single, probs[0], atol=1e-5, rtol=1e-5)
    # Tight check vs. a reference mirroring the kernel's bf16/f32 math.
    assert jnp.allclose(probs, ref_bf16, atol=2e-3, rtol=2e-3)
    # Loose check vs. the pure-f32 PyTorch-equivalent forward.
    assert jnp.allclose(probs, ref_f32, atol=2e-2, rtol=2e-2)
    # Exact softmax normalization: rows sum to 1.
    assert jnp.allclose(jnp.sum(probs, axis=-1), 1.0, atol=1e-3)
    assert jnp.allclose(jnp.sum(probs_small, axis=-1), 1.0, atol=1e-3)

    print("KERNEL_OK")
</pallas_src>

<mosaic_0001>
module attributes {stable_mosaic.version = 11 : i64} {
  func.func @_ppo_policy_kernel(%arg0: i32, %arg1: memref<32x32xf32, #tpu.memory_space<vmem>>, %arg2: memref<32x64xbf16, #tpu.memory_space<vmem>>, %arg3: memref<1x64xf32, #tpu.memory_space<vmem>>, %arg4: memref<64x8xbf16, #tpu.memory_space<vmem>>, %arg5: memref<1x8xf32, #tpu.memory_space<vmem>>, %arg6: memref<32x8xf32, #tpu.memory_space<vmem>>) attributes {dimension_semantics = [#tpu.dimension_semantics<parallel>], iteration_bounds = array<i64: 2>, scalar_prefetch = 0 : i64, scratch_operands = 0 : i64, tpu.core_type = #tpu.core_type<tc>, window_params = [{transform_indices = @transform_0, window_bounds = array<i64: 32, 32>}, {pipeline_mode = #tpu.pipeline_mode<synchronous>, transform_indices = @transform_1, window_bounds = array<i64: 32, 64>}, {pipeline_mode = #tpu.pipeline_mode<synchronous>, transform_indices = @transform_2, window_bounds = array<i64: 1, 64>}, {pipeline_mode = #tpu.pipeline_mode<synchronous>, transform_indices = @transform_3, window_bounds = array<i64: 64, 8>}, {pipeline_mode = #tpu.pipeline_mode<synchronous>, transform_indices = @transform_4, window_bounds = array<i64: 1, 8>}, {transform_indices = @transform_5, window_bounds = array<i64: 32, 8>}]} {
    %c0 = arith.constant 0 : index
    %c0_0 = arith.constant 0 : index
    %0 = vector.load %arg1[%c0, %c0_0] : memref<32x32xf32, #tpu.memory_space<vmem>>, vector<32x32xf32>
    %1 = arith.truncf %0 : vector<32x32xf32> to vector<32x32xbf16>
    %c0_1 = arith.constant 0 : index
    %c0_2 = arith.constant 0 : index
    %2 = vector.load %arg2[%c0_1, %c0_2] : memref<32x64xbf16, #tpu.memory_space<vmem>>, vector<32x64xbf16>
    %cst = arith.constant dense<0.000000e+00> : vector<32x64xf32>
    %3 = tpu.matmul %1, %2, %cst {dimension_numbers = #tpu.dot_dimension_numbers<[1], [0], [0], [1], [0, 0, 1, 1], [], []>} : vector<32x32xbf16>, vector<32x64xbf16>, vector<32x64xf32> -> vector<32x64xf32>
    %c0_3 = arith.constant 0 : index
    %c0_4 = arith.constant 0 : index
    %4 = vector.load %arg3[%c0_3, %c0_4] : memref<1x64xf32, #tpu.memory_space<vmem>>, vector<1x64xf32>
    %5 = vector.broadcast %4 : vector<1x64xf32> to vector<32x64xf32>
    %6 = arith.addf %3, %5 : vector<32x64xf32>
    %cst_5 = arith.constant 0.000000e+00 : f32
    %7 = vector.broadcast %cst_5 : f32 to vector<32x64xf32>
    %8 = arith.maximumf %6, %7 : vector<32x64xf32>
    %9 = arith.truncf %8 : vector<32x64xf32> to vector<32x64xbf16>
    %c0_6 = arith.constant 0 : index
    %c0_7 = arith.constant 0 : index
    %10 = vector.load %arg4[%c0_6, %c0_7] : memref<64x8xbf16, #tpu.memory_space<vmem>>, vector<64x8xbf16>
    %cst_8 = arith.constant dense<0.000000e+00> : vector<32x8xf32>
    %11 = tpu.matmul %9, %10, %cst_8 {dimension_numbers = #tpu.dot_dimension_numbers<[1], [0], [0], [1], [0, 0, 1, 1], [], []>} : vector<32x64xbf16>, vector<64x8xbf16>, vector<32x8xf32> -> vector<32x8xf32>
    %c0_9 = arith.constant 0 : index
    %c0_10 = arith.constant 0 : index
    %12 = vector.load %arg5[%c0_9, %c0_10] : memref<1x8xf32, #tpu.memory_space<vmem>>, vector<1x8xf32>
    %13 = vector.broadcast %12 : vector<1x8xf32> to vector<32x8xf32>
    %14 = arith.addf %11, %13 : vector<32x8xf32>
    %cst_11 = arith.constant dense<0xFF800000> : vector<32xf32>
    %15 = vector.multi_reduction <maximumf>, %14, %cst_11 [1] : vector<32x8xf32> to vector<32xf32>
    %16 = vector.shape_cast %15 : vector<32xf32> to vector<32x1xf32>
    %17 = vector.broadcast %16 : vector<32x1xf32> to vector<32x8xf32>
    %18 = arith.subf %14, %17 : vector<32x8xf32>
    %19 = math.exp %18 : vector<32x8xf32>
    %cst_12 = arith.constant dense<0.000000e+00> : vector<32xf32>
    %20 = vector.multi_reduction <add>, %19, %cst_12 [1] : vector<32x8xf32> to vector<32xf32>
    %21 = vector.shape_cast %20 : vector<32xf32> to vector<32x1xf32>
    %22 = vector.broadcast %21 : vector<32x1xf32> to vector<32x8xf32>
    %23 = arith.divf %19, %22 : vector<32x8xf32>
    %c0_13 = arith.constant 0 : index
    %c0_14 = arith.constant 0 : index
    %24 = vector.load %arg6[%c0_13, %c0_14] : memref<32x8xf32, #tpu.memory_space<vmem>>, vector<32x8xf32>
    tpu.vector_store %arg6[%c0_13, %c0_14], %23 {strides = array<i32>} : memref<32x8xf32, #tpu.memory_space<vmem>>, vector<32x8xf32>,
    return
  }
  func.func @transform_0(%arg0: i32) -> (i32, i32) {
    %c0_i32 = arith.constant 0 : i32
    %c0_i32_0 = arith.constant 0 : i32
    return %arg0, %c0_i32 : i32, i32
  }
  func.func @transform_1(%arg0: i32) -> (i32, i32) {
    %c0_i32 = arith.constant 0 : i32
    %c0_i32_0 = arith.constant 0 : i32
    %c0_i32_1 = arith.constant 0 : i32
    return %c0_i32, %c0_i32_0 : i32, i32
  }
  func.func @transform_2(%arg0: i32) -> (i32, i32) {
    %c0_i32 = arith.constant 0 : i32
    %c0_i32_0 = arith.constant 0 : i32
    %c0_i32_1 = arith.constant 0 : i32
    return %c0_i32, %c0_i32_0 : i32, i32
  }
  func.func @transform_3(%arg0: i32) -> (i32, i32) {
    %c0_i32 = arith.constant 0 : i32
    %c0_i32_0 = arith.constant 0 : i32
    %c0_i32_1 = arith.constant 0 : i32
    return %c0_i32, %c0_i32_0 : i32, i32
  }
  func.func @transform_4(%arg0: i32) -> (i32, i32) {
    %c0_i32 = arith.constant 0 : i32
    %c0_i32_0 = arith.constant 0 : i32
    %c0_i32_1 = arith.constant 0 : i32
    return %c0_i32, %c0_i32_0 : i32, i32
  }
  func.func @transform_5(%arg0: i32) -> (i32, i32) {
    %c0_i32 = arith.constant 0 : i32
    %c0_i32_0 = arith.constant 0 : i32
    return %arg0, %c0_i32 : i32, i32
  }
}

</mosaic_0001>

<bundles_post_ra>
// kernel: ppo_policy_forward.1
= control target key start
LH: loop header
LB: loop body
LE: loop exit
PB: predicated region body
PF: predicated region fallthrough
CT: control target
= control target key end

     0   :  { %s1006_s18 = smov 0   ;;  %s1008_s19 = smov 0   ;;  %s1142_s0 = inlined_call_operand.vmem [shape: f32[50,32], index: 0, kind: input, shape index: {}]   ;;  %s1143_s1 = inlined_call_operand.vmem [shape: bf16[32,64], index: 1, kind: input, shape index: {}]   ;;  %s1144_s2 = inlined_call_operand.vmem [shape: f32[1,64], index: 2, kind: input, shape index: {}]   ;;  %s1145_s3 = inlined_call_operand.vmem [shape: bf16[64,8], index: 3, kind: input, shape index: {}]   ;;  %s1146_s4 = inlined_call_operand.vmem [shape: f32[1,8], index: 4, kind: input, shape index: {}]   ;;  %s1147_s5 = inlined_call_operand.vmem [shape: f32[50,8], index: 5, kind: output, shape index: {}]  }
   0x1   :  { %s1010_s20 = smov 0  }
   0x2 LB: > { %s1019_s21 = sadd.s32 4294967295, %s942_s20   ;;  %s1021_s22 = sadd.s32 1, %s942_s20   ;;  %s942_s20 = sphi %s1010_s20, %s1154_s20   ;;  %s938_s19 = sphi %s1008_s19, %s1153_s19   ;;  %s934_s18 = sphi %s1006_s18, %s1152_s18  }
   0x3   : > { %s129_s23 = ssub.s32 %s942_s20, %s1021_s22  ;;  %s132_s24 = sadd.s32 1, %s938_s19 }
   0x4   : > { %p130_p0 = scmp.eq.s32.totalorder %s129_s23, 0  ;;  %p142_p1 = scmp.ne.s32.totalorder %s938_s19, %s934_s18 }
   0x5   : > { %p143_p2 = scmp.eq.s32.totalorder %s1019_s21, 1  ;;  %p712_p3 = scmp.ge.s32.totalorder %s942_s20, 1 }
   0x6   : > { %s1029_s25 = scalar_select %p130_p0, %s938_s19, %s132_s24  }
   0x7   : > { %p1031_p4 = por %p143_p2, %p142_p1  ;;  %p196_p5 = scmp.lt.s32.totalorder %s942_s20, 3 }
   0x9   : > { %p197_p6 = pnand %p712_p3, %p196_p5 }
   0xa   : > { %v866_v0 = vld [vmem:[%s1143_s1] sm:$0xff] (!%p197_p6)   ;;  %s1039_s29 = sshll.u32 (!%p197_p6), %s1019_s21, 2  ;;  %v867_v1 = vld [vmem:[%s1143_s1 + $0x8] sm:$0xff] (!%p197_p6)   ;;  %vm276_vm0 = vcmask (!%p197_p6), 261120   ;;  %v870_v10 = vld [vmem:[%s1145_s3 + $0x10] sm:$0xff] (!%p197_p6)   ;;  %vm377_vm1 = vcmask (!%p197_p6), 523264  }
   0xb   : > { %200 = sbr.rel (%p197_p6) target bundleno = 835 (0x343), region = 40  ;;  %p232_p7 = scmp.lt.s32.totalorder (!%p197_p6), %s1039_s29, 6  ;;  %758 = vmatprep.subr.bf16.mxu0 (!%p197_p6), %v866_v0  ;;  %v868_v2 = vld [vmem:[%s1145_s3] sm:$0xff] (!%p197_p6)   ;;  %v869_v3 = vld [vmem:[%s1145_s3 + $0x8] sm:$0xff] (!%p197_p6)   ;;  %v871_v11 = vld [vmem:[%s1145_s3 + $0x18] sm:$0xff] (!%p197_p6)   ;;  %vm433_vm2 = vcmask (!%p197_p6), 64512  }
   0xc   : > { %759 = vmatpush3.bf16.msra.mxu0 (!%p197_p6), %v866_v0  ;;  %766 = vmatprep.subr.bf16.mxu1 (!%p197_p6), %v868_v2  ;;  %v716_v12 = vld [vmem:[%s1144_s2] ss:$0 sm:$0xff] (!%p197_p6)  ;;  %s224_s6 = sand.u32 (!%p197_p6), 1, %s934_s18  }
   0xd   : > { %760 = vmatprep.subr.bf16.mxu0 (!%p197_p6), %v867_v1  ;;  %767 = vmatpush3.bf16.msra.mxu1 (!%p197_p6), %v868_v2  ;;  %v721_v27 = vld [vmem:[%s1146_s4] ss:$0 sm:$0xff] (!%p197_p6)  ;;  %s713_s7 = sshll.u32 (!%p197_p6), %s224_s6, 5 }
   0xe   : > { %768 = vmatprep.subr.bf16.mxu1 (!%p197_p6), %v869_v3  ;;  %s1076_s8 = scalar_lea.vmem (!%p197_p6), [#allocation2], %s713_s7  }
  0x10   : > { %761 = vmatpush3.bf16.msra.mxu0 (!%p197_p6), %v867_v1 }
  0x11   : > { %769 = vmatpush3.bf16.msra.mxu1 (!%p197_p6), %v869_v3 }
  0x12   : > { %s233_s9 = scalar_select %p232_p7, %s1039_s29, 6  ;;  %770 = vmatprep.subr.bf16.mxu1 %v870_v10 }
  0x13   : > { %s490_s18 = ssub.s32 (%p1031_p4), 7, %s1039_s29 }
  0x14   : > { %s715_s12 = sshll.u32 %s233_s9, 3  ;;  %s745_s9 = sshll.u32 (%p1031_p4), %s1019_s21, 5 }
  0x15   : > { %s235_s15 = scalar_lea.vmem %s1142_s0, %s715_s12  ;;  %771 = vmatpush3.bf16.msra.mxu1 %v870_v10  ;;  %p491_p8 = scmp.lt.s32.totalorder (%p1031_p4), %s490_s18, 4 }
  0x16   : > { %v247_v4 = vld [vmem:[%s235_s15] sm:$0xff]  ;;  %v248_v5 = vld [vmem:[%s235_s15 + $0x8] sm:$0xff]  ;;  %v249_v6 = vld [vmem:[%s235_s15 + $0x10] sm:$0xff]  ;;  %772 = vmatprep.subr.bf16.mxu1 %v871_v11  ;;  %s1093_s12 = scalar_lea.vmem (%p1031_p4), %s1147_s5, %s745_s9  }
  0x17   : > { %v251_v7 = vpack.c.bf16 %v248_v5, %v247_v4  ;;  %v250_v8 = vld [vmem:[%s235_s15 + $0x18] sm:$0xff] }
  0x18   : > { %v252_v9 = vpack.c.bf16 %v250_v8, %v249_v6 }
  0x19   : > { %762 = vmatprep.mubr.msk.bf16.mxu0 %vm276_vm0, %v251_v7  ;;  %773 = vmatpush3.bf16.msra.mxu1 %v871_v11 }
  0x1a   : > { %763 = vmatmul.mubr.msk.bf16.vlgmr.msra.gmra.mrb[0].mxu0 %vm276_vm0, %v252_v9 }
  0xed   : > { %v764_v13 = vpop.f32.mrb[0].mxu0 }
  0xee   : > { %v326_v14 = vadd.f32 %v764_v13, %v716_v12  ;;  %v317_v15 = vpop.f32.mrb[1].mxu0 }
  0xef   : > { %v318_v16 = vadd.f32 %v716_v12, %v317_v15  ;;  %v765_v17 = vpop.f32.mrb[2].mxu0 }
  0xf0   : > { %v329_v18 = vadd.f32 %v765_v17, %v716_v12  ;;  %v320_v19 = vpop.f32.mrb[3].mxu0  ;;  %v334_v21 = vmax.f32 %v326_v14, 0.0 }
  0xf1   : > { %v321_v20 = vadd.f32 %v716_v12, %v320_v19  ;;  %v332_v23 = vmax.f32 %v318_v16, 0.0 }
  0xf2   : > { %v335_v22 = vmax.f32 %v329_v18, 0.0 }
  0xf3   : > { %v333_v24 = vmax.f32 %v321_v20, 0.0 }
  0xf4   : > { %v337_v25 = vpack.c.bf16 %v335_v22, %v334_v21 }
  0xf5   : > { %v336_v26 = vpack.c.bf16 %v333_v24, %v332_v23 }
  0xf7   : > { %774 = vmatprep.mubr.msk.bf16.mxu1 %vm377_vm1, %v336_v26 }
  0xf8   : > { %775 = vmatmul.mubr.msk.bf16.vlgmr.msra.gmra.mrb[0].mxu1 %vm377_vm1, %v337_v25 }
 0x1cb   : > { %v776_v28 = vpop.f32.mrb[0].mxu1 }
 0x1cc   : > { %v427_v29 = vadd.f32 %v776_v28, %v721_v27  ;;  %v418_v30 = vpop.f32.mrb[1].mxu1 }
 0x1cd   : > { %v419_v31 = vadd.f32 %v721_v27, %v418_v30  ;;  %v777_v32 = vpop.f32.mrb[2].mxu1 }
 0x1ce   : > { %v430_v33 = vadd.f32 %v777_v32, %v721_v27  ;;  %v421_v34 = vpop.f32.mrb[3].mxu1  ;;  %v440_v35 = vsel %vm433_vm2, %v427_v29, -inf }
 0x1cf   : > { %v422_v36 = vadd.f32 %v721_v27, %v421_v34  ;;  %441 = vmax.xlane.f32.xlu1 %v440_v35  ;;  %v434_v37 = vsel %vm433_vm2, %v419_v31, -inf }
 0x1d0   : > { %435 = vmax.xlane.f32.xlu0 %v434_v37  ;;  %v443_v38 = vsel %vm433_vm2, %v430_v33, -inf }
 0x1d1   : > { %v437_v39 = vsel %vm433_vm2, %v422_v36, -inf }
 0x1d3   : > { %444 = vmax.xlane.f32.xlu1 %v443_v38 }
 0x1d4   : > { %438 = vmax.xlane.f32.xlu0 %v437_v39 }
 0x25c   : > { %v442_v40 = vpop.xlane.xlu1 %441 }
 0x25d   : > { %v448_v41 = vsub.f32 %v427_v29, %v442_v40  ;;  %v436_v42 = vpop.xlane.xlu0 %435 }
 0x25e   : > { %v446_v43 = vsub.f32 %v419_v31, %v436_v42 }
 0x25f   : > { %v454_v44 = vmul.f32 1.442695, %v448_v41 }
 0x260   : > { %v450_v45 = vmul.f32 1.442695, %v446_v43  ;;  %v445_v46 = vpop.xlane.xlu1 %444 }
 0x261   : > { %v449_v47 = vsub.f32 %v430_v33, %v445_v46  ;;  %v439_v48 = vpop.xlane.xlu0 %438 }
 0x262   : > { %872 = vpow2.f32 %v450_v45  ;;  %v447_v49 = vsub.f32 %v422_v36, %v439_v48 }
 0x263   : > { %874 = vpow2.f32 %v454_v44  ;;  %v456_v50 = vmul.f32 1.442695, %v449_v47 }
 0x264   : > { %v452_v51 = vmul.f32 1.442695, %v447_v49 }
 0x266   : > { %876 = vpow2.f32 %v452_v51 }
 0x267   : > { %878 = vpow2.f32 %v456_v50 }
 0x26c   : > { %v873_v52 = vpop.eup %872 }
 0x26d   : > { %v458_v53 = vsel %vm433_vm2, %v873_v52, 0.0  ;;  %v875_v54 = vpop.eup %874 }
 0x26e   : > { %459 = vadd.xlane.f32.xlu0 %v458_v53  ;;  %v464_v56 = vsel %vm433_vm2, %v875_v54, 0.0 }
 0x270   : > { %v877_v55 = vpop.eup %876 }
 0x271   : > { %v461_v57 = vsel %vm433_vm2, %v877_v55, 0.0  ;;  %v879_v58 = vpop.eup %878 }
 0x272   : > { %465 = vadd.xlane.f32.xlu0 %v464_v56  ;;  %462 = vadd.xlane.f32.xlu1 %v461_v57  ;;  %v467_v59 = vsel %vm433_vm2, %v879_v58, 0.0 }
 0x276   : > { %468 = vadd.xlane.f32.xlu1 %v467_v59 }
 0x2fb   : > { %v460_v60 = vpop.xlane.xlu0 %459 }
 0x2fc   : > { %880 = vrcp.f32 %v460_v60 }
 0x2ff   : > { %v463_v61 = vpop.xlane.xlu1 %462  ;;  %v466_v62 = vpop.xlane.xlu0 %465 }
 0x300   : > { %882 = vrcp.f32 %v463_v61 }
 0x301   : > { %884 = vrcp.f32 %v466_v62 }
 0x303   : > { %v469_v63 = vpop.xlane.xlu1 %468 }
 0x304   : > { %886 = vrcp.f32 %v469_v63 }
 0x306   : > { %v881_v0 = vpop.eup %880 }
 0x307   : > { %v471_v1 = vmul.f32 %v881_v0, %v873_v52 }
 0x309   : > { %478 = vst.msk [vmem:[%s1076_s8] sm:$0xff] %vm433_vm2, %v471_v1 }
 0x30a   : > { %v883_v2 = vpop.eup %882 }
 0x30b   : > { %v885_v3 = vpop.eup %884  ;;  %v473_v4 = vmul.f32 %v883_v2, %v877_v55  ;;  %488 = sbr.rel (!%p1031_p4) target bundleno = 835 (0x343), region = 44 }
 0x30c   : > { %v475_v5 = vmul.f32 %v885_v3, %v875_v54 }
 0x30d   : > { %479 = vst.msk [vmem:[%s1076_s8 + $0x8] sm:$0xff] %vm433_vm2, %v473_v4 }
 0x30e   : > { %v887_v6 = vpop.eup %886  ;;  %480 = vst.msk [vmem:[%s1076_s8 + $0x10] sm:$0xff] %vm433_vm2, %v475_v5 }
 0x30f   : > { %v477_v7 = vmul.f32 %v887_v6, %v879_v58 }
 0x311   : > { %481 = vst.msk [vmem:[%s1076_s8 + $0x18] sm:$0xff] %vm433_vm2, %v477_v7 }
 0x312   : > { %s1156_s18 = smov (!%p491_p8, %s490_s18), 4 }
 0x313   : > { %s730_s13 = sshll.u32 %s1156_s18, 7 }
 0x314   : > { %p733_p9 = scmp.eq.s32.totalorder %s730_s13, 0 }
 0x315   : > { %s1099_s14 = sshrl.u32 (!%p733_p9), %s1156_s18, 2 }
 0x316   : > { %499 = sbr.rel (%p733_p9) target bundleno = 835 (0x343), region = 48  ;;  %p734_p10 = scmp.le.s32.totalorder (!%p733_p9), %s1099_s14, 0 }
 0x31d   : > { %665 = sbr.rel (%p734_p10) target bundleno = 814 (0x32e), region = 124  ;;  %s1149_s21 = smov (!%p734_p10), %s1093_s12 }
 0x31e   : > { %s1150_s26 = smov (!%p734_p10), %s1076_s8  ;;  %s1108_s29 = smov (!%p734_p10), 0  }
 0x31f   : > { %s956_s15 = smov (!%p734_p10), 0  }
 0x324 LB: >> { %v567_v8 = vld [vmem:[%s950_s26] sm:$0xff]  ;;  %v569_v9 = vld [vmem:[%s950_s26 + $0x8] sm:$0xff]  ;;  %v571_v10 = vld [vmem:[%s950_s26 + $0x10] sm:$0xff]  ;;  %s575_s16 = sadd.s32 1, %s954_s29  ;;  %s561_s15 = sadd.s32 1, %s958_s15   ;;  %s958_s15 = sphi %s956_s15, %s561_s15   ;;  %s954_s29 = sphi %s1108_s29, %s1151_s29   ;;  %s950_s26 = sphi %s1150_s26, %s580_s26   ;;  %s946_s21 = sphi %s1149_s21, %s581_s21  }
 0x325   : >> { %568 = vst [vmem:[%s946_s21] sm:$0xff] %v567_v8  ;;  %570 = vst [vmem:[%s946_s21 + $0x8] sm:$0xff] %v569_v9  ;;  %v573_v11 = vld [vmem:[%s950_s26 + $0x18] sm:$0xff]  ;;  %p576_p11 = scmp.ge.s32.totalorder %s575_s16, %s1099_s14  ;;  %p560_p12 = scmp.ge.s32.totalorder %s561_s15, %s1099_s14 }
 0x326   : >> { %572 = vst [vmem:[%s946_s21 + $0x10] sm:$0xff] %v571_v10  ;;  %574 = vst [vmem:[%s946_s21 + $0x18] sm:$0xff] %v573_v11 }
 0x327   : >> { %s1158_s16 = smov (%p576_p11, %s575_s16), 0  ;;  %563 = sbr.rel (!%p560_p12) target bundleno = 804 (0x324), region = 130 }
 0x328   : >> { %s735_s17 = sshll.u32 %s1158_s16, 5  ;;  %s1151_s29 = smov %s1158_s16 }
 0x329   : >> { %s580_s26 = scalar_lea.vmem %s1076_s8, %s735_s17 [#allocation2]   ;;  %s581_s21 = scalar_lea.vmem %s1093_s12, %s735_s17  }
 0x32e PF: > { %s1124_s20 = sand.u32 3, %s1156_s18   ;;  %s746_s23 = sshll.u32 %s1099_s14, 5 }
 0x32f   : > { %s586_s24 = scalar_lea.vmem %s1076_s8, %s746_s23 [#allocation2]   ;;  %s588_s27 = scalar_lea.vmem %s1093_s12, %s746_s23  }
 0x330   : > { %p740_p13 = scmp.le.s32.totalorder %s1124_s20, 0 }
 0x331   : > { %s960_s28 = smov (!%p740_p13), %s588_s27   ;;  %s964_s30 = smov (!%p740_p13), %s586_s24  }
 0x332   : > { %679 = sbr.rel (%p740_p13) target bundleno = 835 (0x343), region = 135  ;;  %s968_s6 = smov (!%p740_p13), 0  }
 0x333   : > { %s972_s7 = smov (!%p740_p13), 0  }
 0x339 LB: >> { %v598_v12 = vld [vmem:[%s966_s30] sm:$0xff]  ;;  %s600_s18 = sadd.s32 1, %s970_s6  ;;  %s592_s7 = sadd.s32 1, %s974_s7   ;;  %s974_s7 = sphi %s972_s7, %s592_s7   ;;  %s970_s6 = sphi %s968_s6, %s969_s6   ;;  %s966_s30 = sphi %s964_s30, %s605_s30   ;;  %s962_s28 = sphi %s960_s28, %s606_s28  }
 0x33a   : >> { %599 = vst [vmem:[%s962_s28] sm:$0xff] %v598_v12  ;;  %p601_p0 = scmp.ge.s32.totalorder %s600_s18, %s1124_s20  ;;  %p591_p1 = scmp.ge.s32.totalorder %s592_s7, %s1124_s20 }
 0x33c   : >> { %s1160_s18 = smov (%p601_p0, %s600_s18), 0  ;;  %594 = sbr.rel (!%p591_p1) target bundleno = 825 (0x339), region = 141 }
 0x33d   : >> { %s741_s8 = sshll.u32 %s1160_s18, 3  ;;  %s969_s6 = smov %s1160_s18  }
 0x33e   : >> { %s605_s30 = scalar_lea.vmem %s586_s24, %s741_s8 [#allocation2]   ;;  %s606_s28 = scalar_lea.vmem %s588_s27, %s741_s8  }
 0x343 PF: > { %p12_p2 = scmp.ge.s32.totalorder %s1021_s22, 4   ;;  %s1152_s18 = smov %s938_s19 }
 0x344   : > { %s1153_s19 = smov %s1029_s25  ;;  %s1154_s20 = smov %s1021_s22 }
 0x345   :  { %14 = sbr.rel (!%p12_p2) target bundleno = 2 (0x2), region = 152 }

</bundles_post_ra>
